<compile_context>
chip_gen: v5e
topology: v5e:2x2
jax: 0.10.0
libtpu: 0.0.40
codegen_flags: <defaults>
</compile_context>

<pallas_src>
import functools

import jax
import jax.numpy as jnp
from jax import lax
from jax.experimental import pallas as pl
from jax.experimental.pallas import tpu as pltpu


def _input_proj_kernel(x_ref, w_ref, b_ref, o_ref):
    """(row_tile, I) @ (I, H) matmul on the MXU; f32 accumulate + bias."""
    acc = jnp.dot(x_ref[...], w_ref[...], preferred_element_type=jnp.float32)
    o_ref[...] = (acc + b_ref[...]).astype(o_ref.dtype)


def _recurrence_kernel(ext_ref, wh_ref, out_ref, h_scratch, *, tb, oneminusalpha):
    """Serial CTRNN recurrence over a chunk of `tb` timesteps.

    ext_ref   : (tb, B, H)  precomputed  alpha*(x_t @ W_in + b_in + b_h)
    wh_ref    : (H, H)      alpha * W_h  (constant index_map => fetched once)
    out_ref   : (tb, B, H)  stacked hidden states for this chunk
    h_scratch : (B, H) f32  carried hidden state (persists across grid steps)
    """
    @pl.when(pl.program_id(0) == 0)
    def _():
        h_scratch[...] = jnp.zeros_like(h_scratch)   # init_hidden()

    wh = wh_ref[...]                                  # hoisted load, alpha folded

    def step(t, h):
        # pre = alpha * (x_t @ W_in + b_in + h @ W_h + b_h)   (alpha pre-folded)
        pre = jnp.dot(h.astype(wh.dtype), wh, preferred_element_type=jnp.float32)
        pre = pre + ext_ref[t].astype(jnp.float32)
        h_new = jnp.maximum(h * oneminusalpha + pre, 0.0)
        out_ref[t] = h_new.astype(out_ref.dtype)
        return h_new

    # Fully unrolled so the LLO scheduler sees across the tiny per-step bodies.
    h_final = lax.fori_loop(0, tb, step, h_scratch[...], unroll=True)
    h_scratch[...] = h_final


def ctrnn_md_forward(x, w_in, b_in, w_h, b_h, *, alpha, sub_id=None,
                     time_block=8, proj_target_rows=512,
                     param_dtype=jnp.float32):
    """CTRNN_MD forward.

    x    : (T, B, I) f32
    w_in : (I, H), w_h: (H, H)  -- pre-transposed (in_features, out_features),
                                   i.e. PyTorch weight.T
    b_in, b_h : (1, H)
    Returns (output (T, B, H) f32, hidden (B, H) f32), same as the PyTorch module.
    sub_id is accepted but unused, exactly as in CTRNN_MD.forward.
    """
    del sub_id  # unused in the reference forward as well
    T, B, I = x.shape
    H = w_in.shape[1]
    alpha_f = float(alpha)
    oneminusalpha = 1.0 - alpha_f

    # ---- fold alpha into the parameters once (amortized over all timesteps) --
    w_in_s = (w_in * alpha_f).astype(param_dtype)            # (I, H)
    w_h_s = (w_h * alpha_f).astype(param_dtype)              # (H, H)
    b_comb = ((b_in + b_h) * alpha_f).astype(jnp.float32)    # (1, H), f32 bias add

    # ---- time blocking: tb for the serial recurrence, tb_proj for the GEMM ---
    tb = max(1, min(time_block, T))
    t_ceil_tb = pl.cdiv(T, tb) * tb
    # Projection chunk: a multiple of tb, sized for ~proj_target_rows GEMM rows,
    # capped so we never pad beyond the recurrence rounding.
    tb_proj = min(tb * max(1, pl.cdiv(proj_target_rows, tb * B)), t_ceil_tb)
    t_pad = pl.cdiv(t_ceil_tb, tb_proj) * tb_proj
    if t_pad != T:
        x = jnp.pad(x, ((0, t_pad - T), (0, 0), (0, 0)))   # padded steps discarded

    # ---- hoisted input projection: row-tiled (T*B, I) @ (I, H) GEMM ---------
    rows = t_pad * B
    row_tile = tb_proj * B
    num_row_tiles = rows // row_tile
    if num_row_tiles <= 1 or row_tile % 8 != 0:
        # Fall back to a single full-array block (always legal).
        num_row_tiles, row_tile = 1, rows

    x2d = x.reshape(rows, I).astype(param_dtype)
    ext2d = pl.pallas_call(
        _input_proj_kernel,
        out_shape=jax.ShapeDtypeStruct((rows, H), param_dtype),
        grid_spec=pltpu.PrefetchScalarGridSpec(
            num_scalar_prefetch=0,
            grid=(num_row_tiles,),
            in_specs=[
                pl.BlockSpec((row_tile, I), lambda r: (r, 0)),
                pl.BlockSpec((I, H), lambda r: (0, 0)),        # resident weights
                pl.BlockSpec((1, H), lambda r: (0, 0)),        # resident bias
            ],
            out_specs=pl.BlockSpec((row_tile, H), lambda r: (r, 0)),
        ),
        compiler_params=pltpu.CompilerParams(
            dimension_semantics=("parallel",),
        ),
    )(x2d, w_in_s, b_comb)
    ext = ext2d.reshape(t_pad, B, H)

    # ---- serial recurrence, chunked over the time axis ----------------------
    kernel = functools.partial(_recurrence_kernel, tb=tb,
                               oneminusalpha=oneminusalpha)
    grid_spec = pltpu.PrefetchScalarGridSpec(
        num_scalar_prefetch=0,
        grid=(t_pad // tb,),
        in_specs=[
            pl.BlockSpec((tb, B, H), lambda c: (c, 0, 0)),   # ext chunk (pipelined)
            # W_h' is resident (constant index_map => fetched once).
            # TODO(synk): for very large H on v7x (64 MiB VMEM), tile the
            # contraction dim or raise vmem_limit_bytes via CompilerParams.
            pl.BlockSpec((H, H), lambda c: (0, 0)),
        ],
        out_specs=pl.BlockSpec((tb, B, H), lambda c: (c, 0, 0)),
        scratch_shapes=[pltpu.VMEM((B, H), jnp.float32)],    # carried hidden
    )
    out = pl.pallas_call(
        kernel,
        out_shape=jax.ShapeDtypeStruct((t_pad, B, H), jnp.float32),
        grid_spec=grid_spec,
        compiler_params=pltpu.CompilerParams(
            # The time recurrence is inherently sequential.
            dimension_semantics=("arbitrary",),
        ),
    )(ext, w_h_s)

    out = out[:T]
    hidden = out[T - 1]
    return out, hidden


def ctrnn_md_reference(x, w_in, b_in, w_h, b_h, *, alpha):
    """Plain-JAX reference matching the PyTorch loop (f32)."""
    oneminusalpha = 1.0 - alpha
    T, B, _ = x.shape
    H = w_in.shape[1]
    h = jnp.zeros((B, H), jnp.float32)
    outs = []
    for t in range(T):
        pre = x[t] @ w_in + b_in + h @ w_h + b_h
        h = jnp.maximum(h * oneminusalpha + pre * alpha, 0.0)
        outs.append(h)
    return jnp.stack(outs, axis=0), h


if __name__ == "__main__":
    # Module hyperparameters (small, consistent with the forward's conventions).
    input_size = 8
    hidden_size = 32
    sub_size = 8          # unused in forward (as in the reference module)
    output_size = 8       # unused in forward
    num_task = 2          # unused in forward
    dt = 10.0
    tau = 100.0
    alpha = dt / tau      # 0.1

    seq_len = 8
    batch = 4

    key = jax.random.PRNGKey(0)
    k_x, k_win, k_bin, k_bh = jax.random.split(key, 4)

    # Inputs: (seq_len, batch, input_size); sub_id accepted but unused.
    x = jax.random.normal(k_x, (seq_len, batch, input_size), dtype=jnp.float32)
    sub_id = jnp.zeros((batch,), jnp.int32)

    # Deterministic parameter init (nn.Linear-style), kernel layout (in, out).
    bound_in = 1.0 / (input_size ** 0.5)
    w_in = jax.random.uniform(k_win, (input_size, hidden_size), jnp.float32,
                              minval=-bound_in, maxval=bound_in)
    b_in = jax.random.uniform(k_bin, (1, hidden_size), jnp.float32,
                              minval=-bound_in, maxval=bound_in)
    # h2h.reset_parameters(): weight = 0.5 * I (symmetric => transpose identical).
    w_h = 0.5 * jnp.eye(hidden_size, dtype=jnp.float32)
    bound_h = 1.0 / (hidden_size ** 0.5)
    b_h = jax.random.uniform(k_bh, (1, hidden_size), jnp.float32,
                             minval=-bound_h, maxval=bound_h)

    # Reference (PyTorch-equivalent loop, f32).
    out_ref, h_ref = ctrnn_md_reference(x, w_in, b_in, w_h, b_h, alpha=alpha)

    # f32 parameter path: strict check against the reference.
    out32, h32 = ctrnn_md_forward(x, w_in, b_in, w_h, b_h, alpha=alpha,
                                  sub_id=sub_id, param_dtype=jnp.float32)
    out32 = jax.block_until_ready(out32)
    h32 = jax.block_until_ready(h32)
    assert out32.shape == (seq_len, batch, hidden_size)
    assert h32.shape == (batch, hidden_size)
    assert jnp.allclose(out32, out_ref, atol=1e-5, rtol=1e-5)
    assert jnp.allclose(h32, h_ref, atol=1e-5, rtol=1e-5)

    # bf16 weight/ext path (MXU-native on v6e/v7x, f32 accumulation): loose check.
    out16, h16 = ctrnn_md_forward(x, w_in, b_in, w_h, b_h, alpha=alpha,
                                  sub_id=sub_id, param_dtype=jnp.bfloat16)
    out16 = jax.block_until_ready(out16)
    h16 = jax.block_until_ready(h16)
    assert jnp.allclose(out16, out_ref, atol=3e-2, rtol=3e-2)
    assert jnp.allclose(h16, h_ref, atol=3e-2, rtol=3e-2)

    # Exercise a longer, non-aligned sequence to hit the row-tiled GEMM path.
    x_long = jax.random.normal(k_x, (37, batch, input_size), dtype=jnp.float32)
    out_l_ref, h_l_ref = ctrnn_md_reference(x_long, w_in, b_in, w_h, b_h,
                                            alpha=alpha)
    out_l, h_l = ctrnn_md_forward(x_long, w_in, b_in, w_h, b_h, alpha=alpha,
                                  sub_id=sub_id, param_dtype=jnp.float32)
    out_l = jax.block_until_ready(out_l)
    assert out_l.shape == (37, batch, hidden_size)
    assert jnp.allclose(out_l, out_l_ref, atol=1e-5, rtol=1e-5)
    assert jnp.allclose(h_l, h_l_ref, atol=1e-5, rtol=1e-5)

    print("KERNEL_OK")
</pallas_src>

<mosaic_0001>
module attributes {stable_mosaic.version = 11 : i64} {
  func.func @_input_proj_kernel(%arg0: i32, %arg1: memref<32x8xf32, #tpu.memory_space<vmem>>, %arg2: memref<8x32xf32, #tpu.memory_space<vmem>>, %arg3: memref<1x32xf32, #tpu.memory_space<vmem>>, %arg4: memref<32x32xf32, #tpu.memory_space<vmem>>) attributes {dimension_semantics = [#tpu.dimension_semantics<parallel>], iteration_bounds = array<i64: 1>, scalar_prefetch = 0 : i64, scratch_operands = 0 : i64, tpu.core_type = #tpu.core_type<tc>, window_params = [{transform_indices = @transform_0, window_bounds = array<i64: 32, 8>}, {pipeline_mode = #tpu.pipeline_mode<synchronous>, transform_indices = @transform_1, window_bounds = array<i64: 8, 32>}, {pipeline_mode = #tpu.pipeline_mode<synchronous>, transform_indices = @transform_2, window_bounds = array<i64: 1, 32>}, {transform_indices = @transform_3, window_bounds = array<i64: 32, 32>}]} {
    %c0 = arith.constant 0 : index
    %c0_0 = arith.constant 0 : index
    %0 = vector.load %arg1[%c0, %c0_0] : memref<32x8xf32, #tpu.memory_space<vmem>>, vector<32x8xf32>
    %c0_1 = arith.constant 0 : index
    %c0_2 = arith.constant 0 : index
    %1 = vector.load %arg2[%c0_1, %c0_2] : memref<8x32xf32, #tpu.memory_space<vmem>>, vector<8x32xf32>
    %cst = arith.constant dense<0.000000e+00> : vector<32x32xf32>
    %2 = tpu.matmul %0, %1, %cst {dimension_numbers = #tpu.dot_dimension_numbers<[1], [0], [0], [1], [0, 0, 1, 1], [], []>} : vector<32x8xf32>, vector<8x32xf32>, vector<32x32xf32> -> vector<32x32xf32>
    %c0_3 = arith.constant 0 : index
    %c0_4 = arith.constant 0 : index
    %3 = vector.load %arg3[%c0_3, %c0_4] : memref<1x32xf32, #tpu.memory_space<vmem>>, vector<1x32xf32>
    %4 = vector.broadcast %3 : vector<1x32xf32> to vector<32x32xf32>
    %5 = arith.addf %2, %4 : vector<32x32xf32>
    %c0_5 = arith.constant 0 : index
    %c0_6 = arith.constant 0 : index
    %6 = vector.load %arg4[%c0_5, %c0_6] : memref<32x32xf32, #tpu.memory_space<vmem>>, vector<32x32xf32>
    tpu.vector_store %arg4[%c0_5, %c0_6], %5 {strides = array<i32>} : memref<32x32xf32, #tpu.memory_space<vmem>>, vector<32x32xf32>,
    return
  }
  func.func @transform_0(%arg0: i32) -> (i32, i32) {
    %c0_i32 = arith.constant 0 : i32
    %c0_i32_0 = arith.constant 0 : i32
    return %arg0, %c0_i32 : i32, i32
  }
  func.func @transform_1(%arg0: i32) -> (i32, i32) {
    %c0_i32 = arith.constant 0 : i32
    %c0_i32_0 = arith.constant 0 : i32
    %c0_i32_1 = arith.constant 0 : i32
    return %c0_i32, %c0_i32_0 : i32, i32
  }
  func.func @transform_2(%arg0: i32) -> (i32, i32) {
    %c0_i32 = arith.constant 0 : i32
    %c0_i32_0 = arith.constant 0 : i32
    %c0_i32_1 = arith.constant 0 : i32
    return %c0_i32, %c0_i32_0 : i32, i32
  }
  func.func @transform_3(%arg0: i32) -> (i32, i32) {
    %c0_i32 = arith.constant 0 : i32
    %c0_i32_0 = arith.constant 0 : i32
    return %arg0, %c0_i32 : i32, i32
  }
}

</mosaic_0001>

<bundles_post_ra>
// kernel: tpu_custom_call.1
= control target key start
LH: loop header
LB: loop body
LE: loop exit
PB: predicated region body
PF: predicated region fallthrough
CT: control target
= control target key end

     0   :  { %vm24_vm0 = vcmask 64512   ;;  %s174_s0 = inlined_call_operand.vmem [shape: f32[32,8], index: 0, kind: input, shape index: {}]   ;;  %s175_s1 = inlined_call_operand.vmem [shape: f32[8,32], index: 1, kind: input, shape index: {}]   ;;  %s176_s2 = inlined_call_operand.vmem [shape: f32[1,32], index: 2, kind: input, shape index: {}]   ;;  %s177_s3 = inlined_call_operand.hbm [shape: f32[32,32], index: 3, kind: output, shape index: {}]  }
   0x1   :  { %v19_v0 = vld [vmem:[%s175_s1] sm:$0xff]  ;;  %v17_v1 = vld [vmem:[%s174_s0 + $0x10] sm:$0xff]  ;;  %v18_v2 = vld [vmem:[%s174_s0 + $0x18] sm:$0xff] }
   0x2   :  { %94 = vmatpush.msra.mxu2 %v19_v0  ;;  %95 = vmatpush.msra.mxu3 %v19_v0  ;;  %v15_v3 = vld [vmem:[%s174_s0] sm:$0xff]  ;;  %v16_v4 = vld [vmem:[%s174_s0 + $0x8] sm:$0xff] }
   0x3   :  { %91 = vmatmul.msk.f32.vlgmr.msra.gmra.mxu2 %vm24_vm0, %v17_v1  ;;  %92 = vmatmul.msk.f32.vlgmr.msra.gmra.mxu3 %vm24_vm0, %v18_v2 }
   0x4   :  { %8 = vsyncpa [#allocation3], 0  ;;  %52 = vmatpush.msra.mxu0 %v19_v0  ;;  %93 = vmatpush.msra.mxu1 %v19_v0  ;;  %v99_v5 = vld [vmem:[%s176_s2] ss:$0 sm:$0xff]  ;;  %vm66_vm1 = vcmask 261120   ;;  %s126_s23 = smov [#allocation2]  }
   0x5   :  { %89 = vmatmul.msk.f32.vlgmr.msra.gmra.mxu0 %vm24_vm0, %v15_v3  ;;  %90 = vmatmul.msk.f32.vlgmr.msra.gmra.mxu1 %vm24_vm0, %v16_v4  ;;  %s75_s24 = sshll.u32 %s126_s23, 4  ;;  %s77_s26 = sshll.u32 %s177_s3, 4  ;;  %s76_s24 = int_to_ptr.vmem [resolvable:$true] %s75_s24  ;;  %s78_s26 = int_to_ptr.hbm [resolvable:$true] %s77_s26 }
   0x6   :  { %s127_s2 = smov 128   ;;  %s128_s27 = smov 8  }
  0x82   :  { %v54_v6 = vpop.f32.mrf.mxu0  ;;  %v57_v7 = vpop.f32.mrf.mxu1 }
  0x83   :  { %v55_v8 = vadd.f32 %v99_v5, %v54_v6  ;;  %v58_v9 = vadd.f32 %v99_v5, %v57_v7 }
  0x85   :  { %67 = vst.msk [vmem:[#allocation2] sm:$0xff] %vm66_vm1, %v55_v8 }
  0x86   :  { %68 = vst.msk [vmem:[#allocation2 + $0x8] sm:$0xff] %vm66_vm1, %v58_v9  ;;  %v60_v10 = vpop.f32.mrf.mxu2  ;;  %v63_v11 = vpop.f32.mrf.mxu3 }
  0x87   :  { %v61_v12 = vadd.f32 %v99_v5, %v60_v10  ;;  %v64_v13 = vadd.f32 %v99_v5, %v63_v11 }
  0x89   :  { %69 = vst.msk [vmem:[#allocation2 + $0x10] sm:$0xff] %vm66_vm1, %v61_v12 }
  0x8a   :  { %70 = vst.msk [vmem:[#allocation2 + $0x18] sm:$0xff] %vm66_vm1, %v64_v13 }
  0x8b   :  { %83 = dma.vmem_to_hbm [thread:$0]  %s76_s24, 512, %s78_s26, [#allocation3], %s127_s2, %s127_s2, %s128_s27  }
  0x8c   :  { %124 = dma.done.wait [#allocation3], 512  }
  0x8d   :  { %125 = vsyncadd [#allocation3], 4294966784 }
  0x8e   :  { %88 = vsyncpa [#allocation3], 1 }

</bundles_post_ra>
